<compile_context>
chip_gen: v7x
topology: tpu7x:2x2x1
jax: 0.10.0
libtpu: 0.0.40
codegen_flags: <defaults>
</compile_context>

<pallas_src>
import functools

import jax
import jax.numpy as jnp
from jax.experimental import pallas as pl
from jax.experimental.pallas import tpu as pltpu


LEAKY_SLOPE = 0.01   # nn.LeakyReLU() default negative_slope
BN_EPS = 1e-5        # nn.BatchNorm2d default eps


def _round_up(v, m):
    return (v + m - 1) // m * m


def _conv_stats_kernel(w_ref, mask_ref, x_ref, y_ref, stats_ref, *, kw, wp, lout):
    """Pass 1: conv as KH*KW accumulated matmuls + masked per-image BN partials.

    w_ref:     [KH*KW, F, C]   per-tap weight matrices
    mask_ref:  [1, Lout]       1.0 on valid output columns, 0.0 on row-pad cols
    x_ref:     [1, C, Lin_pad] zero-padded, spatially-flattened input image
    y_ref:     [1, F, Lout]    conv output (un-normalized), lane-dense
    stats_ref: [1, F, 2]       per-image [sum, sumsq] over valid columns
    """
    x = x_ref[0]                                     # [C, Lin_pad]
    f = w_ref.shape[1]
    acc = jnp.zeros((f, lout), jnp.float32)
    # KH*KW shifted-slice matmuls on the MXU (static unroll, static offsets).
    for t in range(w_ref.shape[0]):
        di, dj = t // kw, t % kw
        off = di * wp + dj
        acc += jnp.dot(w_ref[t], x[:, off:off + lout],
                       preferred_element_type=jnp.float32)
    y_ref[0] = acc.astype(y_ref.dtype)

    # Masked partial statistics (row-pad garbage columns excluded from BN).
    m = mask_ref[...]                                # [1, Lout]
    masked = acc * m
    s = jnp.sum(masked, axis=-1, keepdims=True)          # [F, 1]
    ss = jnp.sum(masked * acc, axis=-1, keepdims=True)   # [F, 1]
    stats_ref[0] = jnp.concatenate([s, ss], axis=-1)     # single full-tile store


def _bn_lrelu_kernel(stats_ref, gb_ref, y_ref, o_ref, *, count, eps):
    """Pass 2: reduce BN partials, per-channel affine normalize + LeakyReLU.

    stats_ref: [N, F, 2]     per-image [sum, sumsq] (resident)
    gb_ref:    [F, 2]        column 0 = gamma, column 1 = beta (resident)
    y_ref:     [1, F, Lout]  conv output (aliased with o_ref)
    o_ref:     [1, F, Lout]
    """
    totals = jnp.sum(stats_ref[...], axis=0)             # [F, 2]
    inv_n = 1.0 / count
    mean = totals[:, 0:1] * inv_n                         # [F, 1]
    var = jnp.maximum(totals[:, 1:2] * inv_n - mean * mean, 0.0)  # biased var
    inv_std = jax.lax.rsqrt(var + eps)
    scale = gb_ref[:, 0:1] * inv_std                      # gamma / std
    shift = gb_ref[:, 1:2] - mean * scale                 # beta - mean*scale
    z = y_ref[0] * scale + shift
    o_ref[0] = jnp.where(z >= 0.0, z, LEAKY_SLOPE * z).astype(o_ref.dtype)


@functools.partial(jax.jit,
                   static_argnames=("kernel_size", "stride", "padding", "eps"))
def conv2d_norm_leaky_relu(x, weight, gamma, beta, *, kernel_size, stride=1,
                           padding=0, eps=BN_EPS):
    """x: [N,C,H,W]; weight: [F,C,KH,KW]; gamma/beta: [F]. Returns NCHW.

    Matches Conv2dNormLeakyReLU forward (normalization=True, use_bias=False):
      conv -> BatchNorm2d with batch statistics -> LeakyReLU(0.01).
    """
    if stride != 1:
        # TODO(synk): general stride via strided taps; the module config uses stride=1.
        raise NotImplementedError("only stride=1 is implemented")

    n, c, h, w = x.shape
    f = weight.shape[0]
    kh = kw = kernel_size
    hp, wp = h + 2 * padding, w + 2 * padding
    oh, ow = hp - kh + 1, wp - kw + 1
    lout = oh * wp                       # per-image flat output length (with row pad)
    maxoff = (kh - 1) * wp + (kw - 1)    # largest tap shift
    lin_pad = _round_up(max(hp * wp, lout + maxoff), 128)

    # Flatten padded spatial dims per image: [N, C, Hp*Wp] (+ zero tail).
    xp = jnp.pad(x, ((0, 0), (0, 0), (padding, padding), (padding, padding)))
    xflat = xp.reshape(n, c, hp * wp).astype(jnp.float32)
    xflat = jnp.pad(xflat, ((0, 0), (0, 0), (0, lin_pad - hp * wp)))

    # Per-tap weight matrices [KH*KW, F, C]; tap t = di*KW + dj.
    wt = jnp.transpose(weight, (2, 3, 0, 1)).reshape(kh * kw, f, c)
    wt = wt.astype(jnp.float32)

    # Validity mask over flat output columns (col < OW within each row of Wp).
    mask = (jnp.arange(lout) % wp < ow).astype(jnp.float32).reshape(1, lout)

    kernel1 = functools.partial(_conv_stats_kernel, kw=kw, wp=wp, lout=lout)
    y_flat, stats = pl.pallas_call(
        kernel1,
        grid=(n,),
        in_specs=[
            pl.BlockSpec((kh * kw, f, c), lambda i: (0, 0, 0)),   # weights (resident)
            pl.BlockSpec((1, lout), lambda i: (0, 0)),            # mask (resident)
            pl.BlockSpec((1, c, lin_pad), lambda i: (i, 0, 0)),   # one image per step
        ],
        out_specs=[
            pl.BlockSpec((1, f, lout), lambda i: (i, 0, 0)),
            pl.BlockSpec((1, f, 2), lambda i: (i, 0, 0)),
        ],
        out_shape=[
            jax.ShapeDtypeStruct((n, f, lout), jnp.float32),
            jax.ShapeDtypeStruct((n, f, 2), jnp.float32),
        ],
        compiler_params=pltpu.CompilerParams(
            dimension_semantics=("parallel",),
            vmem_limit_bytes=32 * 1024 * 1024),
    )(wt, mask, xflat)

    # gamma/beta stacked into one tiny [F, 2] array (single DMA).
    gb = jnp.stack([gamma.astype(jnp.float32), beta.astype(jnp.float32)], axis=1)
    count = float(n * oh * ow)
    # TODO(synk): BatchNorm running_mean/running_var buffer updates (training-mode
    # module state mutation) are not computed/returned.

    kernel2 = functools.partial(_bn_lrelu_kernel, count=count, eps=eps)
    out_flat = pl.pallas_call(
        kernel2,
        grid=(n,),
        in_specs=[
            pl.BlockSpec((n, f, 2), lambda i: (0, 0, 0)),         # stats (resident)
            pl.BlockSpec((f, 2), lambda i: (0, 0)),               # gamma/beta (resident)
            pl.BlockSpec((1, f, lout), lambda i: (i, 0, 0)),      # conv output
        ],
        out_specs=pl.BlockSpec((1, f, lout), lambda i: (i, 0, 0)),
        out_shape=jax.ShapeDtypeStruct((n, f, lout), jnp.float32),
        input_output_aliases={2: 0},                  # normalize y in place
        compiler_params=pltpu.CompilerParams(
            dimension_semantics=("parallel",),
            vmem_limit_bytes=32 * 1024 * 1024),
    )(stats, gb, y_flat)

    # [N, F, OH*Wp] -> [N, F, OH, Wp] -> drop per-row garbage cols -> NCHW.
    out = out_flat.reshape(n, f, oh, wp)[:, :, :, :ow]
    return out


if __name__ == "__main__":
    # Module config: input_shape=(2,4,16,16), num_filters=8, kernel_size=3,
    # stride=1, padding=1, use_bias=False (default), normalization=True.
    N, C, H, W = 2, 4, 16, 16
    NUM_FILTERS, KSIZE, STRIDE, PAD = 8, 3, 1, 1

    key = jax.random.PRNGKey(0)
    k_x, k_w = jax.random.split(key, 2)

    x = jax.random.normal(k_x, (N, C, H, W), dtype=jnp.float32)
    fan_in = C * KSIZE * KSIZE
    bound = 1.0 / (fan_in ** 0.5)
    conv_w = jax.random.uniform(k_w, (NUM_FILTERS, C, KSIZE, KSIZE),
                                minval=-bound, maxval=bound, dtype=jnp.float32)
    bn_gamma = jnp.ones((NUM_FILTERS,), dtype=jnp.float32)
    bn_beta = jnp.zeros((NUM_FILTERS,), dtype=jnp.float32)

    out = conv2d_norm_leaky_relu(x, conv_w, bn_gamma, bn_beta,
                                 kernel_size=KSIZE, stride=STRIDE, padding=PAD)
    out = jax.block_until_ready(out)
    assert out.shape == (N, NUM_FILTERS, H, W), out.shape

    # Reference: XLA conv -> BatchNorm (batch stats, biased var) -> LeakyReLU.
    ref = jax.lax.conv_general_dilated(
        x, conv_w, window_strides=(STRIDE, STRIDE),
        padding=((PAD, PAD), (PAD, PAD)),
        dimension_numbers=("NCHW", "OIHW", "NCHW"),
        precision=jax.lax.Precision.HIGHEST)
    r_mean = ref.mean(axis=(0, 2, 3), keepdims=True)
    r_var = ref.var(axis=(0, 2, 3), keepdims=True)
    refn = (ref - r_mean) * jax.lax.rsqrt(r_var + BN_EPS)
    refn = refn * bn_gamma.reshape(1, -1, 1, 1) + bn_beta.reshape(1, -1, 1, 1)
    ref_out = jnp.where(refn >= 0.0, refn, LEAKY_SLOPE * refn)
    max_err = float(jnp.max(jnp.abs(out - ref_out)))
    assert max_err < 1e-2, max_err

    print("KERNEL_OK")
</pallas_src>

<mosaic_0001>
module attributes {stable_mosaic.version = 11 : i64} {
  func.func @_bn_lrelu_kernel(%arg0: i32, %arg1: memref<2x8x2xf32, #tpu.memory_space<vmem>>, %arg2: memref<8x2xf32, #tpu.memory_space<vmem>>, %arg3: memref<1x8x288xf32, #tpu.memory_space<vmem>>, %arg4: memref<1x8x288xf32, #tpu.memory_space<vmem>>) attributes {dimension_semantics = [#tpu.dimension_semantics<parallel>], iteration_bounds = array<i64: 2>, scalar_prefetch = 0 : i64, scratch_operands = 0 : i64, tpu.core_type = #tpu.core_type<tc>, window_params = [{pipeline_mode = #tpu.pipeline_mode<synchronous>, transform_indices = @transform_0, window_bounds = array<i64: 2, 8, 2>}, {pipeline_mode = #tpu.pipeline_mode<synchronous>, transform_indices = @transform_1, window_bounds = array<i64: 8, 2>}, {transform_indices = @transform_2, window_bounds = array<i64: 1, 8, 288>}, {transform_indices = @transform_3, window_bounds = array<i64: 1, 8, 288>}]} {
    %c0 = arith.constant 0 : index
    %c0_0 = arith.constant 0 : index
    %c0_1 = arith.constant 0 : index
    %0 = vector.load %arg1[%c0, %c0_0, %c0_1] : memref<2x8x2xf32, #tpu.memory_space<vmem>>, vector<2x8x2xf32>
    %cst = arith.constant dense<0.000000e+00> : vector<8x2xf32>
    %1 = vector.multi_reduction <add>, %0, %cst [0] : vector<2x8x2xf32> to vector<8x2xf32>
    %2 = vector.extract_strided_slice %1 {offsets = [0, 0], sizes = [8, 1], strides = [1, 1]} : vector<8x2xf32> to vector<8x1xf32>
    %cst_2 = arith.constant 0.001953125 : f32
    %3 = vector.broadcast %cst_2 : f32 to vector<8x1xf32>
    %4 = arith.mulf %2, %3 : vector<8x1xf32>
    %5 = vector.extract_strided_slice %1 {offsets = [0, 1], sizes = [8, 1], strides = [1, 1]} : vector<8x2xf32> to vector<8x1xf32>
    %cst_3 = arith.constant 0.001953125 : f32
    %6 = vector.broadcast %cst_3 : f32 to vector<8x1xf32>
    %7 = arith.mulf %5, %6 : vector<8x1xf32>
    %8 = arith.mulf %4, %4 : vector<8x1xf32>
    %9 = arith.subf %7, %8 : vector<8x1xf32>
    %cst_4 = arith.constant 0.000000e+00 : f32
    %10 = vector.broadcast %cst_4 : f32 to vector<8x1xf32>
    %11 = arith.maximumf %9, %10 : vector<8x1xf32>
    %cst_5 = arith.constant 9.99999974E-6 : f32
    %12 = vector.broadcast %cst_5 : f32 to vector<8x1xf32>
    %13 = arith.addf %11, %12 : vector<8x1xf32>
    %14 = math.rsqrt %13 : vector<8x1xf32>
    %c0_6 = arith.constant 0 : index
    %c0_7 = arith.constant 0 : index
    %15 = vector.load %arg2[%c0_6, %c0_7] : memref<8x2xf32, #tpu.memory_space<vmem>>, vector<8x1xf32>
    %16 = arith.mulf %15, %14 : vector<8x1xf32>
    %c0_8 = arith.constant 0 : index
    %c1 = arith.constant 1 : index
    %17 = vector.load %arg2[%c0_8, %c1] : memref<8x2xf32, #tpu.memory_space<vmem>>, vector<8x1xf32>
    %18 = arith.mulf %4, %16 : vector<8x1xf32>
    %19 = arith.subf %17, %18 : vector<8x1xf32>
    %c0_9 = arith.constant 0 : index
    %c0_10 = arith.constant 0 : index
    %c0_11 = arith.constant 0 : index
    %20 = vector.load %arg3[%c0_9, %c0_10, %c0_11] : memref<1x8x288xf32, #tpu.memory_space<vmem>>, vector<1x8x288xf32>
    %21 = vector.shape_cast %20 : vector<1x8x288xf32> to vector<8x288xf32>
    %22 = vector.broadcast %16 : vector<8x1xf32> to vector<8x288xf32>
    %23 = arith.mulf %21, %22 : vector<8x288xf32>
    %24 = vector.broadcast %19 : vector<8x1xf32> to vector<8x288xf32>
    %25 = arith.addf %23, %24 : vector<8x288xf32>
    %cst_12 = arith.constant 0.000000e+00 : f32
    %26 = vector.broadcast %cst_12 : f32 to vector<8x288xf32>
    %27 = arith.cmpf oge, %25, %26 : vector<8x288xf32>
    %cst_13 = arith.constant 0.00999999977 : f32
    %28 = vector.broadcast %cst_13 : f32 to vector<8x288xf32>
    %29 = arith.mulf %28, %25 : vector<8x288xf32>
    %30 = arith.select %27, %25, %29 : vector<8x288xi1>, vector<8x288xf32>
    %c0_14 = arith.constant 0 : index
    %c0_15 = arith.constant 0 : index
    %c0_16 = arith.constant 0 : index
    %31 = vector.load %arg4[%c0_14, %c0_15, %c0_16] : memref<1x8x288xf32, #tpu.memory_space<vmem>>, vector<1x8x288xf32>
    %32 = vector.shape_cast %31 : vector<1x8x288xf32> to vector<8x288xf32>
    %33 = vector.shape_cast %30 : vector<8x288xf32> to vector<1x8x288xf32>
    tpu.vector_store %arg4[%c0_14, %c0_15, %c0_16], %33 {strides = array<i32>} : memref<1x8x288xf32, #tpu.memory_space<vmem>>, vector<1x8x288xf32>,
    return
  }
  func.func @transform_0(%arg0: i32) -> (i32, i32, i32) {
    %c0_i32 = arith.constant 0 : i32
    %c0_i32_0 = arith.constant 0 : i32
    %c0_i32_1 = arith.constant 0 : i32
    %c0_i32_2 = arith.constant 0 : i32
    return %c0_i32, %c0_i32_0, %c0_i32_1 : i32, i32, i32
  }
  func.func @transform_1(%arg0: i32) -> (i32, i32) {
    %c0_i32 = arith.constant 0 : i32
    %c0_i32_0 = arith.constant 0 : i32
    %c0_i32_1 = arith.constant 0 : i32
    return %c0_i32, %c0_i32_0 : i32, i32
  }
  func.func @transform_2(%arg0: i32) -> (i32, i32, i32) {
    %c0_i32 = arith.constant 0 : i32
    %c0_i32_0 = arith.constant 0 : i32
    %c0_i32_1 = arith.constant 0 : i32
    return %arg0, %c0_i32, %c0_i32_0 : i32, i32, i32
  }
  func.func @transform_3(%arg0: i32) -> (i32, i32, i32) {
    %c0_i32 = arith.constant 0 : i32
    %c0_i32_0 = arith.constant 0 : i32
    %c0_i32_1 = arith.constant 0 : i32
    return %arg0, %c0_i32, %c0_i32_0 : i32, i32, i32
  }
}

module attributes {stable_mosaic.version = 11 : i64} {
  func.func @_conv_stats_kernel(%arg0: i32, %arg1: memref<9x8x4xf32, #tpu.memory_space<vmem>>, %arg2: memref<1x288xf32, #tpu.memory_space<vmem>>, %arg3: memref<1x4x384xf32, #tpu.memory_space<vmem>>, %arg4: memref<1x8x288xf32, #tpu.memory_space<vmem>>, %arg5: memref<1x8x2xf32, #tpu.memory_space<vmem>>) attributes {dimension_semantics = [#tpu.dimension_semantics<parallel>], iteration_bounds = array<i64: 2>, scalar_prefetch = 0 : i64, scratch_operands = 0 : i64, tpu.core_type = #tpu.core_type<tc>, window_params = [{pipeline_mode = #tpu.pipeline_mode<synchronous>, transform_indices = @transform_0, window_bounds = array<i64: 9, 8, 4>}, {pipeline_mode = #tpu.pipeline_mode<synchronous>, transform_indices = @transform_1, window_bounds = array<i64: 1, 288>}, {transform_indices = @transform_2, window_bounds = array<i64: 1, 4, 384>}, {transform_indices = @transform_3, window_bounds = array<i64: 1, 8, 288>}, {transform_indices = @transform_4, window_bounds = array<i64: 1, 8, 2>}]} {
    %c0 = arith.constant 0 : index
    %c0_0 = arith.constant 0 : index
    %c0_1 = arith.constant 0 : index
    %0 = vector.load %arg3[%c0, %c0_0, %c0_1] : memref<1x4x384xf32, #tpu.memory_space<vmem>>, vector<1x4x384xf32>
    %1 = vector.shape_cast %0 : vector<1x4x384xf32> to vector<4x384xf32>
    %cst = arith.constant 0.000000e+00 : f32
    %2 = vector.broadcast %cst : f32 to vector<8x288xf32>
    %c0_2 = arith.constant 0 : index
    %c0_3 = arith.constant 0 : index
    %c0_4 = arith.constant 0 : index
    %3 = vector.load %arg1[%c0_2, %c0_3, %c0_4] : memref<9x8x4xf32, #tpu.memory_space<vmem>>, vector<1x8x4xf32>
    %4 = vector.shape_cast %3 : vector<1x8x4xf32> to vector<8x4xf32>
    %5 = vector.extract_strided_slice %1 {offsets = [0, 0], sizes = [4, 288], strides = [1, 1]} : vector<4x384xf32> to vector<4x288xf32>
    %cst_5 = arith.constant dense<0.000000e+00> : vector<8x288xf32>
    %6 = tpu.matmul %4, %5, %cst_5 {dimension_numbers = #tpu.dot_dimension_numbers<[1], [0], [0], [1], [0, 0, 1, 1], [], []>} : vector<8x4xf32>, vector<4x288xf32>, vector<8x288xf32> -> vector<8x288xf32>
    %7 = arith.addf %2, %6 : vector<8x288xf32>
    %c1 = arith.constant 1 : index
    %c0_6 = arith.constant 0 : index
    %c0_7 = arith.constant 0 : index
    %8 = vector.load %arg1[%c1, %c0_6, %c0_7] : memref<9x8x4xf32, #tpu.memory_space<vmem>>, vector<1x8x4xf32>
    %9 = vector.shape_cast %8 : vector<1x8x4xf32> to vector<8x4xf32>
    %10 = vector.extract_strided_slice %1 {offsets = [0, 1], sizes = [4, 288], strides = [1, 1]} : vector<4x384xf32> to vector<4x288xf32>
    %cst_8 = arith.constant dense<0.000000e+00> : vector<8x288xf32>
    %11 = tpu.matmul %9, %10, %cst_8 {dimension_numbers = #tpu.dot_dimension_numbers<[1], [0], [0], [1], [0, 0, 1, 1], [], []>} : vector<8x4xf32>, vector<4x288xf32>, vector<8x288xf32> -> vector<8x288xf32>
    %12 = arith.addf %7, %11 : vector<8x288xf32>
    %c2 = arith.constant 2 : index
    %c0_9 = arith.constant 0 : index
    %c0_10 = arith.constant 0 : index
    %13 = vector.load %arg1[%c2, %c0_9, %c0_10] : memref<9x8x4xf32, #tpu.memory_space<vmem>>, vector<1x8x4xf32>
    %14 = vector.shape_cast %13 : vector<1x8x4xf32> to vector<8x4xf32>
    %15 = vector.extract_strided_slice %1 {offsets = [0, 2], sizes = [4, 288], strides = [1, 1]} : vector<4x384xf32> to vector<4x288xf32>
    %cst_11 = arith.constant dense<0.000000e+00> : vector<8x288xf32>
    %16 = tpu.matmul %14, %15, %cst_11 {dimension_numbers = #tpu.dot_dimension_numbers<[1], [0], [0], [1], [0, 0, 1, 1], [], []>} : vector<8x4xf32>, vector<4x288xf32>, vector<8x288xf32> -> vector<8x288xf32>
    %17 = arith.addf %12, %16 : vector<8x288xf32>
    %c3 = arith.constant 3 : index
    %c0_12 = arith.constant 0 : index
    %c0_13 = arith.constant 0 : index
    %18 = vector.load %arg1[%c3, %c0_12, %c0_13] : memref<9x8x4xf32, #tpu.memory_space<vmem>>, vector<1x8x4xf32>
    %19 = vector.shape_cast %18 : vector<1x8x4xf32> to vector<8x4xf32>
    %20 = vector.extract_strided_slice %1 {offsets = [0, 18], sizes = [4, 288], strides = [1, 1]} : vector<4x384xf32> to vector<4x288xf32>
    %cst_14 = arith.constant dense<0.000000e+00> : vector<8x288xf32>
    %21 = tpu.matmul %19, %20, %cst_14 {dimension_numbers = #tpu.dot_dimension_numbers<[1], [0], [0], [1], [0, 0, 1, 1], [], []>} : vector<8x4xf32>, vector<4x288xf32>, vector<8x288xf32> -> vector<8x288xf32>
    %22 = arith.addf %17, %21 : vector<8x288xf32>
    %c4 = arith.constant 4 : index
    %c0_15 = arith.constant 0 : index
    %c0_16 = arith.constant 0 : index
    %23 = vector.load %arg1[%c4, %c0_15, %c0_16] : memref<9x8x4xf32, #tpu.memory_space<vmem>>, vector<1x8x4xf32>
    %24 = vector.shape_cast %23 : vector<1x8x4xf32> to vector<8x4xf32>
    %25 = vector.extract_strided_slice %1 {offsets = [0, 19], sizes = [4, 288], strides = [1, 1]} : vector<4x384xf32> to vector<4x288xf32>
    %cst_17 = arith.constant dense<0.000000e+00> : vector<8x288xf32>
    %26 = tpu.matmul %24, %25, %cst_17 {dimension_numbers = #tpu.dot_dimension_numbers<[1], [0], [0], [1], [0, 0, 1, 1], [], []>} : vector<8x4xf32>, vector<4x288xf32>, vector<8x288xf32> -> vector<8x288xf32>
    %27 = arith.addf %22, %26 : vector<8x288xf32>
    %c5 = arith.constant 5 : index
    %c0_18 = arith.constant 0 : index
    %c0_19 = arith.constant 0 : index
    %28 = vector.load %arg1[%c5, %c0_18, %c0_19] : memref<9x8x4xf32, #tpu.memory_space<vmem>>, vector<1x8x4xf32>
    %29 = vector.shape_cast %28 : vector<1x8x4xf32> to vector<8x4xf32>
    %30 = vector.extract_strided_slice %1 {offsets = [0, 20], sizes = [4, 288], strides = [1, 1]} : vector<4x384xf32> to vector<4x288xf32>
    %cst_20 = arith.constant dense<0.000000e+00> : vector<8x288xf32>
    %31 = tpu.matmul %29, %30, %cst_20 {dimension_numbers = #tpu.dot_dimension_numbers<[1], [0], [0], [1], [0, 0, 1, 1], [], []>} : vector<8x4xf32>, vector<4x288xf32>, vector<8x288xf32> -> vector<8x288xf32>
    %32 = arith.addf %27, %31 : vector<8x288xf32>
    %c6 = arith.constant 6 : index
    %c0_21 = arith.constant 0 : index
    %c0_22 = arith.constant 0 : index
    %33 = vector.load %arg1[%c6, %c0_21, %c0_22] : memref<9x8x4xf32, #tpu.memory_space<vmem>>, vector<1x8x4xf32>
    %34 = vector.shape_cast %33 : vector<1x8x4xf32> to vector<8x4xf32>
    %35 = vector.extract_strided_slice %1 {offsets = [0, 36], sizes = [4, 288], strides = [1, 1]} : vector<4x384xf32> to vector<4x288xf32>
    %cst_23 = arith.constant dense<0.000000e+00> : vector<8x288xf32>
    %36 = tpu.matmul %34, %35, %cst_23 {dimension_numbers = #tpu.dot_dimension_numbers<[1], [0], [0], [1], [0, 0, 1, 1], [], []>} : vector<8x4xf32>, vector<4x288xf32>, vector<8x288xf32> -> vector<8x288xf32>
    %37 = arith.addf %32, %36 : vector<8x288xf32>
    %c7 = arith.constant 7 : index
    %c0_24 = arith.constant 0 : index
    %c0_25 = arith.constant 0 : index
    %38 = vector.load %arg1[%c7, %c0_24, %c0_25] : memref<9x8x4xf32, #tpu.memory_space<vmem>>, vector<1x8x4xf32>
    %39 = vector.shape_cast %38 : vector<1x8x4xf32> to vector<8x4xf32>
    %40 = vector.extract_strided_slice %1 {offsets = [0, 37], sizes = [4, 288], strides = [1, 1]} : vector<4x384xf32> to vector<4x288xf32>
    %cst_26 = arith.constant dense<0.000000e+00> : vector<8x288xf32>
    %41 = tpu.matmul %39, %40, %cst_26 {dimension_numbers = #tpu.dot_dimension_numbers<[1], [0], [0], [1], [0, 0, 1, 1], [], []>} : vector<8x4xf32>, vector<4x288xf32>, vector<8x288xf32> -> vector<8x288xf32>
    %42 = arith.addf %37, %41 : vector<8x288xf32>
    %c8 = arith.constant 8 : index
    %c0_27 = arith.constant 0 : index
    %c0_28 = arith.constant 0 : index
    %43 = vector.load %arg1[%c8, %c0_27, %c0_28] : memref<9x8x4xf32, #tpu.memory_space<vmem>>, vector<1x8x4xf32>
    %44 = vector.shape_cast %43 : vector<1x8x4xf32> to vector<8x4xf32>
    %45 = vector.extract_strided_slice %1 {offsets = [0, 38], sizes = [4, 288], strides = [1, 1]} : vector<4x384xf32> to vector<4x288xf32>
    %cst_29 = arith.constant dense<0.000000e+00> : vector<8x288xf32>
    %46 = tpu.matmul %44, %45, %cst_29 {dimension_numbers = #tpu.dot_dimension_numbers<[1], [0], [0], [1], [0, 0, 1, 1], [], []>} : vector<8x4xf32>, vector<4x288xf32>, vector<8x288xf32> -> vector<8x288xf32>
    %47 = arith.addf %42, %46 : vector<8x288xf32>
    %c0_30 = arith.constant 0 : index
    %c0_31 = arith.constant 0 : index
    %c0_32 = arith.constant 0 : index
    %48 = vector.load %arg4[%c0_30, %c0_31, %c0_32] : memref<1x8x288xf32, #tpu.memory_space<vmem>>, vector<1x8x288xf32>
    %49 = vector.shape_cast %48 : vector<1x8x288xf32> to vector<8x288xf32>
    %50 = vector.shape_cast %47 : vector<8x288xf32> to vector<1x8x288xf32>
    tpu.vector_store %arg4[%c0_30, %c0_31, %c0_32], %50 {strides = array<i32>} : memref<1x8x288xf32, #tpu.memory_space<vmem>>, vector<1x8x288xf32>,
    %c0_33 = arith.constant 0 : index
    %c0_34 = arith.constant 0 : index
    %51 = vector.load %arg2[%c0_33, %c0_34] : memref<1x288xf32, #tpu.memory_space<vmem>>, vector<1x288xf32>
    %52 = vector.broadcast %51 : vector<1x288xf32> to vector<8x288xf32>
    %53 = arith.mulf %47, %52 : vector<8x288xf32>
    %cst_35 = arith.constant dense<0.000000e+00> : vector<8xf32>
    %54 = vector.multi_reduction <add>, %53, %cst_35 [1] : vector<8x288xf32> to vector<8xf32>
    %55 = vector.shape_cast %54 : vector<8xf32> to vector<8x1xf32>
    %56 = arith.mulf %53, %47 : vector<8x288xf32>
    %cst_36 = arith.constant dense<0.000000e+00> : vector<8xf32>
    %57 = vector.multi_reduction <add>, %56, %cst_36 [1] : vector<8x288xf32> to vector<8xf32>
    %58 = vector.shape_cast %57 : vector<8xf32> to vector<8x1xf32>
    %59 = tpu.concatenate %55, %58 in 1 : vector<8x1xf32>, vector<8x1xf32> -> vector<8x2xf32>
    %c0_37 = arith.constant 0 : index
    %c0_38 = arith.constant 0 : index
    %c0_39 = arith.constant 0 : index
    %60 = vector.load %arg5[%c0_37, %c0_38, %c0_39] : memref<1x8x2xf32, #tpu.memory_space<vmem>>, vector<1x8x2xf32>
    %61 = vector.shape_cast %60 : vector<1x8x2xf32> to vector<8x2xf32>
    %62 = vector.shape_cast %59 : vector<8x2xf32> to vector<1x8x2xf32>
    tpu.vector_store %arg5[%c0_37, %c0_38, %c0_39], %62 {strides = array<i32>} : memref<1x8x2xf32, #tpu.memory_space<vmem>>, vector<1x8x2xf32>,
    return
  }
  func.func @transform_0(%arg0: i32) -> (i32, i32, i32) {
    %c0_i32 = arith.constant 0 : i32
    %c0_i32_0 = arith.constant 0 : i32
    %c0_i32_1 = arith.constant 0 : i32
    %c0_i32_2 = arith.constant 0 : i32
    return %c0_i32, %c0_i32_0, %c0_i32_1 : i32, i32, i32
  }
  func.func @transform_1(%arg0: i32) -> (i32, i32) {
    %c0_i32 = arith.constant 0 : i32
    %c0_i32_0 = arith.constant 0 : i32
    %c0_i32_1 = arith.constant 0 : i32
    return %c0_i32, %c0_i32_0 : i32, i32
  }
  func.func @transform_2(%arg0: i32) -> (i32, i32, i32) {
    %c0_i32 = arith.constant 0 : i32
    %c0_i32_0 = arith.constant 0 : i32
    %c0_i32_1 = arith.constant 0 : i32
    return %arg0, %c0_i32, %c0_i32_0 : i32, i32, i32
  }
  func.func @transform_3(%arg0: i32) -> (i32, i32, i32) {
    %c0_i32 = arith.constant 0 : i32
    %c0_i32_0 = arith.constant 0 : i32
    %c0_i32_1 = arith.constant 0 : i32
    return %arg0, %c0_i32, %c0_i32_0 : i32, i32, i32
  }
  func.func @transform_4(%arg0: i32) -> (i32, i32, i32) {
    %c0_i32 = arith.constant 0 : i32
    %c0_i32_0 = arith.constant 0 : i32
    %c0_i32_1 = arith.constant 0 : i32
    return %arg0, %c0_i32, %c0_i32_0 : i32, i32, i32
  }
}

</mosaic_0001>

<bundles_post_ra>
// kernel: conv2d_norm_leaky_relu.3
= control target key start
LH: loop header
LB: loop body
LE: loop exit
PB: predicated region body
PF: predicated region fallthrough
CT: control target
= control target key end

     0   :  { %s344_s12 = smov 0   ;;  %s374_s0 = inlined_call_operand.vmem [shape: f32[2,8,2], index: 0, kind: input, shape index: {}]   ;;  %s375_s1 = inlined_call_operand.vmem [shape: f32[8,2], index: 1, kind: input, shape index: {}]   ;;  %s376_s2 = inlined_call_operand.vmem [shape: f32[2,8,288], index: 2, kind: input, shape index: {}, may-alias: {2,3}]   ;;  %s377_s3 = inlined_call_operand.vmem [shape: f32[2,8,288], index: 3, kind: output, shape index: {}, may-alias: {2,3}]  }
   0x1 LB: > { %s286_s13 = sadd.s32 4294967295, %s318_s12   ;;  %p290_p0 = scmp.ge.s32.totalorder %s318_s12, 1  ;;  %s318_s12 = sphi %s344_s12, %s13_s12  }
   0x2   : > { %p137_p1 = scmp.lt.s32.totalorder %s318_s12, 3 }
   0x4   : > { %p138_p2 = pnand %p290_p0, %p137_p1 }
   0x5   : > { %v171_v0 = vld [vmem:[%s374_s0] sm:$0xff] (!%p138_p2)  ;;  %v172_v1 = vld [vmem:[%s374_s0 + $0x8] sm:$0xff] (!%p138_p2)  ;;  %vm173_vm0 = vcmask (!%p138_p2), 15360   ;;  %s320_s18 = smov (!%p138_p2), 1   ;;  %v321_v11 = vmov (!%p138_p2), 0   ;;  %s322_s19 = smov (!%p138_p2), 127  }
   0x6   : > { %141 = sbr.rel (%p138_p2) target bundleno = 516 (0x204), region = 32  ;;  %v174_v2 = vsel (!%p138_p2), %vm173_vm0, %v171_v0, 0.0  ;;  %v175_v3 = vsel (!%p138_p2), %vm173_vm0, %v172_v1, 0.0  ;;  %308 = vset.pattern.permute.xlu1 (!%p138_p2), %v321_v11  ;;  %v323_v13 = vmov (!%p138_p2), 1   ;;  %v187_v14 = vld [vmem:[%s375_s1] sm:$0xff] (!%p138_p2)  ;;  %p161_p3 = scmp.lt.s32.totalorder (!%p138_p2), %s286_s13, 1 }
   0x7   : > { %v176_v4 = vadd.f32 (!%p138_p2), %v175_v3, %v174_v2  ;;  %309 = vset.pattern.permute.xlu0 (!%p138_p2), %v323_v13  ;;  %vm229_vm4 = vcmask (!%p138_p2), 261120  }
   0x9   : > { %v177_v5 = vmul.f32 (!%p138_p2), 0.001953125, %v176_v4 }
   0xb   : > { %v178_v6 = vmul.f32 (!%p138_p2), %v177_v5, %v177_v5 }
   0xd   : > { %180 = vrot.lane.b32.xlu0 %v178_v6, %s320_s18  ;;  %s379_s13 = smov (!%p161_p3, %s286_s13), 1 }
   0xe   : > { %s295_s22 = smul.u32 24, %s379_s13 }
  0x10   : > { %s165_s25 = scalar_lea.vmem %s376_s2, %s295_s22  ;;  %s170_s28 = scalar_lea.vmem %s377_s3, %s295_s22 }
  0x11   : > { %v199_v21 = vld [vmem:[%s165_s25] sm:$0xff]  ;;  %v200_v22 = vld [vmem:[%s165_s25 + $0x8] sm:$0xff]  ;;  %v201_v23 = vld [vmem:[%s165_s25 + $0x10] sm:$0xff] }
  0x7f   : > { %v181_v7 = vpop.permute.xlu0 %180 }
  0x80   : > { %v183_v8 = vsub.f32 %v177_v5, %v181_v7 }
  0x82   : > { %v184_v9 = vmax.f32 %v183_v8, 0.0 }
  0x84   : > { %v185_v10 = vadd.f32 1e-05, %v184_v9 }
  0x86   : > { %310 = vrsqrt.f32 %v185_v10 }
  0x90   : > { %v311_v12 = vpop.eup %310 }
  0x91   : > { %189 = vrot.lane.b32.xlu0 %v311_v12, %s322_s19 }
 0x103   : > { %v190_v15 = vpop.permute.xlu0 %189 }
 0x104   : > { %v192_v16 = vmul.f32 %v190_v15, %v187_v14 }
 0x106   : > { %v193_v17 = vmul.f32 %v192_v16, %v177_v5 }
 0x108   : > { %195 = vrot.lane.b32.xlu1 %v193_v17, %s320_s18 }
 0x10c   : > { %204 = vperm.xlu1 %308, %v192_v16  }
 0x17a   : > { %v196_v18 = vpop.permute.xlu1 %195 }
 0x17b   : > { %v198_v19 = vsub.f32 %v187_v14, %v196_v18 }
 0x17d   : > { %212 = vperm.xlu0 %309, %v198_v19  }
 0x18b   : > { %v205_v20 = vpop.permute.xlu1 %204 }
 0x18c   : > { %v207_v24 = vmul.f32 %v205_v20, %v199_v21  ;;  %v208_v25 = vmul.f32 %v205_v20, %v200_v22  ;;  %v209_v26 = vmul.f32 %v205_v20, %v201_v23 }
 0x1fc   : > { %v213_v27 = vpop.permute.xlu0 %212 }
 0x1fd   : > { %v215_v28 = vadd.f32 %v213_v27, %v207_v24  ;;  %v216_v29 = vadd.f32 %v213_v27, %v208_v25  ;;  %v217_v30 = vadd.f32 %v213_v27, %v209_v26 }
 0x1ff   : > { %vm218_vm1 = vcmp.ge.f32.partialorder %v215_v28, 0.0  ;;  %vm219_vm2 = vcmp.ge.f32.partialorder %v216_v29, 0.0  ;;  %vm220_vm3 = vcmp.ge.f32.partialorder %v217_v30, 0.0  ;;  %v221_v31 = vmul.f32 0.01, %v215_v28 }
 0x200   : > { %v222_v32 = vmul.f32 0.01, %v216_v29  ;;  %v223_v33 = vmul.f32 0.01, %v217_v30 }
 0x201   : > { %v224_v34 = vsel %vm218_vm1, %v215_v28, %v221_v31 }
 0x202   : > { %v225_v35 = vsel %vm219_vm2, %v216_v29, %v222_v32  ;;  %v226_v36 = vsel %vm220_vm3, %v217_v30, %v223_v33  ;;  %227 = vst [vmem:[%s170_s28] sm:$0xff] %v224_v34 }
 0x203   : > { %228 = vst [vmem:[%s170_s28 + $0x8] sm:$0xff] %v225_v35  ;;  %230 = vst.msk [vmem:[%s170_s28 + $0x10] sm:$0xff] %vm229_vm4, %v226_v36 }
 0x204 PF: > { %s13_s12 = sadd.s32 1, %s318_s12  }
 0x205   : > { %p10_p4 = scmp.ge.s32.totalorder %s13_s12, 4  }
 0x207   :  { %12 = sbr.rel (!%p10_p4) target bundleno = 1 (0x1), region = 62 }

// kernel: conv2d_norm_leaky_relu.2
= control target key start
LH: loop header
LB: loop body
LE: loop exit
PB: predicated region body
PF: predicated region fallthrough
CT: control target
= control target key end

     0   :  { %s2025_s15 = smov 0   ;;  %s2176_s0 = inlined_call_operand.vmem [shape: f32[9,8,4], index: 0, kind: input, shape index: {}]   ;;  %s2177_s1 = inlined_call_operand.vmem [shape: f32[1,288], index: 1, kind: input, shape index: {}]   ;;  %s2178_s2 = inlined_call_operand.vmem [shape: f32[2,4,384], index: 2, kind: input, shape index: {}]   ;;  %s2179_s3 = inlined_call_operand.vmem [shape: f32[2,8,288], index: 3, kind: output, shape index: {0}]   ;;  %s2180_s4 = inlined_call_operand.vmem [shape: f32[2,8,2], index: 4, kind: output, shape index: {1}]  }
   0x1 LB: > { %s1803_s16 = sadd.s32 4294967295, %s1988_s15   ;;  %p1807_p0 = scmp.ge.s32.totalorder %s1988_s15, 1  ;;  %s1988_s15 = sphi %s2025_s15, %s15_s15  }
   0x2   : > { %p165_p1 = scmp.lt.s32.totalorder %s1988_s15, 3 }
   0x4   : > { %p166_p2 = pnand %p1807_p0, %p165_p1 }
   0x5   : > { %p195_p3 = scmp.lt.s32.totalorder (!%p166_p2), %s1803_s16, 1  ;;  %v1990_v0 = vmov (!%p166_p2), 0.0   ;;  %vm1991_vm0 = vmmov (!%p166_p2), 0   ;;  %s1992_s21 = smov (!%p166_p2), 127   ;;  %vm230_vm1 = vcmask (!%p166_p2), 1043456   ;;  %vm223_vm2 = vcmask (!%p166_p2), 1039360  }
   0x6   : > { %169 = sbr.rel (%p166_p2) target bundleno = 571 (0x23b), region = 32  ;;  %1884 = vmatprep.subr.mxu1 (!%p166_p2), %v1990_v0  ;;  %1886 = vmatprep.mubr.msk.f32.mxu1 (!%p166_p2), %vm1991_vm0, %v1990_v0  ;;  %s1993_s22 = smov (!%p166_p2), 126   ;;  %v1811_v7 = vld [vmem:[%s2176_s0 + $0x8] sm:$0xff] (!%p166_p2)  ;;  %vm226_vm3 = vcmask (!%p166_p2), 31744   ;;  %vm536_vm4 = vcmask (!%p166_p2), 1031168   ;;  %v211_v14 = vld [vmem:[%s2176_s0] sm:$0xff] (!%p166_p2)  ;;  %v1682_v53 = vlaneseq (!%p166_p2) }
   0x7   : > { %301 = vmatprep.mubr.f32.mxu0 (!%p166_p2), %v1990_v0  ;;  %s1994_s23 = smov (!%p166_p2), 110   ;;  %s1995_s24 = smov (!%p166_p2), 109   ;;  %vm700_vm5 = vcmask (!%p166_p2), 900096   ;;  %v1822_v21 = vld [vmem:[%s2176_s0 + $0x10] sm:$0xff] (!%p166_p2)  ;;  %vm864_vm6 = vcmask (!%p166_p2), 891904   ;;  %v1828_v27 = vld [vmem:[%s2176_s0 + $0x18] sm:$0xff] (!%p166_p2) }
   0x8   : > { %s1996_s25 = smov (!%p166_p2), 108   ;;  %s1997_s26 = smov (!%p166_p2), 92   ;;  %vm1028_vm7 = vcmask (!%p166_p2), 883712   ;;  %v1834_v33 = vld [vmem:[%s2176_s0 + $0x20] sm:$0xff] (!%p166_p2)  ;;  %vm1192_vm8 = vcmask (!%p166_p2), 752640   ;;  %v1840_v39 = vld [vmem:[%s2176_s0 + $0x28] sm:$0xff] (!%p166_p2) }
   0x9   : > { %s1998_s27 = smov (!%p166_p2), 91   ;;  %s1999_s28 = smov (!%p166_p2), 90   ;;  %vm1356_vm9 = vcmask (!%p166_p2), 744448   ;;  %v1846_v44 = vld [vmem:[%s2176_s0 + $0x30] sm:$0xff] (!%p166_p2)  ;;  %vm1520_vm10 = vcmask (!%p166_p2), 736256   ;;  %v1852_v50 = vld [vmem:[%s2176_s0 + $0x38] sm:$0xff] (!%p166_p2) }
   0xa   : > { %v1858_v52 = vld [vmem:[%s2176_s0 + $0x40] sm:$0xff] (!%p166_p2)  ;;  %v1683_v54 = vshrl.u32 (!%p166_p2), %v1682_v53, 7  ;;  %vm1678_vm11 = vcmask (!%p166_p2), 261120   ;;  %vm1713_vm12 = vcmask (!%p166_p2), 7168   ;;  %vm1715_vm13 = vcmask (!%p166_p2), 15360  }
   0xb   : > { %v1680_v56 = vld [vmem:[%s2177_s1] sm:$0x7] (!%p166_p2) }
   0xc   : > { %v1692_v55 = vsub.s32 (!%p166_p2), 2, %v1683_v54  ;;  %v1684_v57 = vsub.s32 (!%p166_p2), 0, %v1683_v54  ;;  %v1688_v58 = vsub.s32 (!%p166_p2), 1, %v1683_v54 }
   0xd   : > { %s2182_s16 = smov (!%p195_p3, %s1803_s16), 1 }
   0xe   : > { %s1961_s17 = smul.u32 12, %s2182_s16  ;;  %v1693_v59 = vrot.slane %v1680_v56, %v1692_v55  ;;  %v1685_v60 = vrot.slane %v1680_v56, %v1684_v57  ;;  %v1689_v62 = vrot.slane %v1680_v56, %v1688_v58  ;;  %s1810_s29 = sshll.u32 %s2182_s16, 3 }
   0xf   : > { %s208_s6 = scalar_lea.vmem %s2180_s4, %s1810_s29 }
  0x10   : > { %s199_s20 = scalar_lea.vmem %s2178_s2, %s1961_s17 }
  0x11   : > { %v209_v1 = vld [vmem:[%s199_s20] sm:$0xff]  ;;  %v210_v3 = vld [vmem:[%s199_s20 + $0x8] sm:$0xf] }
  0x12   : > { %217 = vrot.lane.b32.xlu1 %v209_v1, %s1992_s21  ;;  %v216_v2 = vcombine.high %v209_v1, %v209_v1 }
  0x14   : > { %219 = vrot.lane.b32.xlu0 %v216_v2, %s1992_s21 }
  0x16   : > { %532 = vrot.lane.b32.xlu1 %v216_v2, %s1993_s22 }
  0x18   : > { %221 = vrot.lane.b32.xlu0 %v210_v3, %s1992_s21 }
  0x1a   : > { %530 = vrot.lane.b32.xlu1 %v209_v1, %s1993_s22 }
  0x1c   : > { %534 = vrot.lane.b32.xlu0 %v210_v3, %s1993_s22 }
  0x1e   : > { %698 = vrot.lane.b32.xlu1 %v210_v3, %s1994_s23 }
  0x20   : > { %696 = vrot.lane.b32.xlu0 %v216_v2, %s1994_s23 }
  0x22   : > { %860 = vrot.lane.b32.xlu1 %v216_v2, %s1995_s24 }
  0x24   : > { %694 = vrot.lane.b32.xlu0 %v209_v1, %s1994_s23  ;;  %s1962_s23 = smul.u32 24, %s2182_s16 }
  0x26   : > { %858 = vrot.lane.b32.xlu1 %v209_v1, %s1995_s24 }
  0x28   : > { %862 = vrot.lane.b32.xlu0 %v210_v3, %s1995_s24 }
  0x2a   : > { %1026 = vrot.lane.b32.xlu1 %v210_v3, %s1996_s25 }
  0x2c   : > { %1024 = vrot.lane.b32.xlu0 %v216_v2, %s1996_s25 }
  0x2e   : > { %1188 = vrot.lane.b32.xlu1 %v216_v2, %s1997_s26 }
  0x30   : > { %1022 = vrot.lane.b32.xlu0 %v209_v1, %s1996_s25 }
  0x32   : > { %1186 = vrot.lane.b32.xlu1 %v209_v1, %s1997_s26 }
  0x34   : > { %1190 = vrot.lane.b32.xlu0 %v210_v3, %s1997_s26 }
  0x36   : > { %1354 = vrot.lane.b32.xlu1 %v210_v3, %s1998_s27 }
  0x38   : > { %1352 = vrot.lane.b32.xlu0 %v216_v2, %s1998_s27 }
  0x3a   : > { %1516 = vrot.lane.b32.xlu1 %v216_v2, %s1999_s28 }
  0x3c   : > { %1350 = vrot.lane.b32.xlu0 %v209_v1, %s1998_s27 }
  0x3e   : > { %1514 = vrot.lane.b32.xlu1 %v209_v1, %s1999_s28 }
  0x40   : > { %1518 = vrot.lane.b32.xlu0 %v210_v3, %s1999_s28  ;;  %s204_s28 = scalar_lea.vmem %s2179_s3, %s1962_s23 }
  0x84   : > { %v218_v4 = vpop.permute.xlu1 %217 }
  0x86   : > { %v220_v5 = vpop.permute.xlu0 %219 }
  0x87   : > { %v224_v10 = vsel %vm223_vm2, %v218_v4, %v220_v5 }
  0x88   : > { %v533_v6 = vpop.permute.xlu1 %532 }
  0x8a   : > { %v222_v8 = vpop.permute.xlu0 %221 }
  0x8b   : > { %1885 = vmatpush3.msk.msra.mxu1 %vm230_vm1, %v222_v8  ;;  %v225_v9 = vsel %vm223_vm2, %v220_v5, %v222_v8 }
  0x8c   : > { %1812 = vmatprep.subr.msk.mxu0 %vm230_vm1, %v225_v9  ;;  %1887 = vmatmul.mubr.msk.f32.vlgmr.msra.gmra.mrb[0].mxu1 %vm226_vm3, %v1811_v7  ;;  %v531_v11 = vpop.permute.xlu1 %530 }
  0x8d   : > { %1813 = vmatpush1.msk.msra.mxu0 %vm230_vm1, %v224_v10  ;;  %1889 = vmatprep.subr.mxu1 %v1990_v0  ;;  %v537_v17 = vsel %vm536_vm4, %v531_v11, %v533_v6 }
  0x8e   : > { %1814 = vmatmul.mubr.msk.f32.vlgmr.msra.gmra.mrb[0].mxu0 %vm226_vm3, %v1811_v7  ;;  %1817 = vmatprep.subr.msk.mxu0 %vm230_vm1, %v216_v2  ;;  %v535_v12 = vpop.permute.xlu0 %534 }
  0x8f   : > { %1818 = vmatpush1.msk.msra.mxu0 %vm230_vm1, %v209_v1  ;;  %1890 = vmatpush3.msk.msra.mxu1 %vm230_vm1, %v210_v3  ;;  %v538_v13 = vsel %vm536_vm4, %v533_v6, %v535_v12 }
  0x90   : > { %1891 = vmatprep.mubr.msk.f32.mxu1 %vm1991_vm0, %v1990_v0  ;;  %1823 = vmatprep.subr.msk.mxu0 %vm230_vm1, %v538_v13  ;;  %v699_v16 = vpop.permute.xlu1 %698 }
  0x91   : > { %1894 = vmatprep.subr.mxu1 %v1990_v0  ;;  %451 = vmatprep.mubr.f32.mxu0 %v1990_v0 }
  0x92   : > { %v697_v15 = vpop.permute.xlu0 %696 }
  0x93   : > { %v702_v18 = vsel %vm700_vm5, %v697_v15, %v699_v16 }
  0x94   : > { %1892 = vmatmul.mubr.msk.f32.vlgmr.msra.gmra.mrb[0].mxu1 %vm226_vm3, %v211_v14  ;;  %v861_v20 = vpop.permute.xlu1 %860 }
  0x95   : > { %1895 = vmatpush3.msk.msra.mxu1 %vm230_vm1, %v535_v12  ;;  %1896 = vmatprep.mubr.msk.f32.mxu1 %vm1991_vm0, %v1990_v0 }
  0x96   : > { %1819 = vmatmul.mubr.msk.f32.vlgmr.msra.gmra.mrb[0].mxu0 %vm226_vm3, %v211_v14  ;;  %v695_v19 = vpop.permute.xlu0 %694  ;;  %1899 = vmatprep.subr.mxu1 %v1990_v0 }
  0x97   : > { %1824 = vmatpush1.msk.msra.mxu0 %vm230_vm1, %v537_v17  ;;  %612 = vmatprep.mubr.f32.mxu0 %v1990_v0  ;;  %v701_v23 = vsel %vm700_vm5, %v695_v19, %v697_v15 }
  0x98   : > { %1829 = vmatprep.subr.msk.mxu0 %vm230_vm1, %v702_v18  ;;  %v859_v25 = vpop.permute.xlu1 %858 }
  0x99   : > { %v865_v29 = vsel %vm864_vm6, %v859_v25, %v861_v20 }
  0x9a   : > { %v863_v22 = vpop.permute.xlu0 %862 }
  0x9b   : > { %v866_v24 = vsel %vm864_vm6, %v861_v20, %v863_v22 }
  0x9c   : > { %1897 = vmatmul.mubr.msk.f32.vlgmr.msra.gmra.mrb[0].mxu1 %vm226_vm3, %v1822_v21  ;;  %v1027_v28 = vpop.permute.xlu1 %1026 }
  0x9d   : > { %1900 = vmatpush3.msk.msra.mxu1 %vm230_vm1, %v699_v16  ;;  %1901 = vmatprep.mubr.msk.f32.mxu1 %vm1991_vm0, %v1990_v0 }
  0x9e   : > { %1825 = vmatmul.mubr.msk.f32.vlgmr.msra.gmra.mrb[0].mxu0 %vm226_vm3, %v1822_v21  ;;  %1904 = vmatprep.subr.mxu1 %v1990_v0  ;;  %v1025_v26 = vpop.permute.xlu0 %1024 }
  0x9f   : > { %1830 = vmatpush1.msk.msra.mxu0 %vm230_vm1, %v701_v23  ;;  %776 = vmatprep.mubr.f32.mxu0 %v1990_v0  ;;  %v1030_v30 = vsel %vm1028_vm7, %v1025_v26, %v1027_v28 }
  0xa0   : > { %1835 = vmatprep.subr.msk.mxu0 %vm230_vm1, %v866_v24  ;;  %v1189_v32 = vpop.permute.xlu1 %1188 }
  0xa2   : > { %v1023_v31 = vpop.permute.xlu0 %1022 }
  0xa3   : > { %v1029_v35 = vsel %vm1028_vm7, %v1023_v31, %v1025_v26 }
  0xa4   : > { %1902 = vmatmul.mubr.msk.f32.vlgmr.msra.gmra.mrb[0].mxu1 %vm226_vm3, %v1828_v27  ;;  %v1187_v37 = vpop.permute.xlu1 %1186 }
  0xa5   : > { %1905 = vmatpush3.msk.msra.mxu1 %vm230_vm1, %v863_v22  ;;  %1906 = vmatprep.mubr.msk.f32.mxu1 %vm1991_vm0, %v1990_v0  ;;  %v1193_v41 = vsel %vm1192_vm8, %v1187_v37, %v1189_v32 }
  0xa6   : > { %1831 = vmatmul.mubr.msk.f32.vlgmr.msra.gmra.mrb[0].mxu0 %vm226_vm3, %v1828_v27  ;;  %1909 = vmatprep.subr.mxu1 %v1990_v0  ;;  %v1191_v34 = vpop.permute.xlu0 %1190 }
  0xa7   : > { %1836 = vmatpush1.msk.msra.mxu0 %vm230_vm1, %v865_v29  ;;  %940 = vmatprep.mubr.f32.mxu0 %v1990_v0  ;;  %v1194_v36 = vsel %vm1192_vm8, %v1189_v32, %v1191_v34 }
  0xa8   : > { %1841 = vmatprep.subr.msk.mxu0 %vm230_vm1, %v1030_v30  ;;  %v1355_v40 = vpop.permute.xlu1 %1354 }
  0xaa   : > { %v1353_v38 = vpop.permute.xlu0 %1352 }
  0xab   : > { %v1358_v42 = vsel %vm1356_vm9, %v1353_v38, %v1355_v40 }
  0xac   : > { %1907 = vmatmul.mubr.msk.f32.vlgmr.msra.gmra.mrb[0].mxu1 %vm226_vm3, %v1834_v33  ;;  %v1517_v46 = vpop.permute.xlu1 %1516 }
  0xad   : > { %1910 = vmatpush3.msk.msra.mxu1 %vm230_vm1, %v1027_v28  ;;  %1911 = vmatprep.mubr.msk.f32.mxu1 %vm1991_vm0, %v1990_v0 }
  0xae   : > { %1837 = vmatmul.mubr.msk.f32.vlgmr.msra.gmra.mrb[0].mxu0 %vm226_vm3, %v1834_v33  ;;  %1914 = vmatprep.subr.mxu1 %v1990_v0  ;;  %v1351_v43 = vpop.permute.xlu0 %1350 }
  0xaf   : > { %1842 = vmatpush1.msk.msra.mxu0 %vm230_vm1, %v1029_v35  ;;  %1104 = vmatprep.mubr.f32.mxu0 %v1990_v0  ;;  %v1357_v47 = vsel %vm1356_vm9, %v1351_v43, %v1353_v38 }
  0xb0   : > { %1847 = vmatprep.subr.msk.mxu0 %vm230_vm1, %v1194_v36  ;;  %v1515_v49 = vpop.permute.xlu1 %1514 }
  0xb1   : > { %v1521_v51 = vsel %vm1520_vm10, %v1515_v49, %v1517_v46 }
  0xb2   : > { %v1519_v45 = vpop.permute.xlu0 %1518 }
  0xb3   : > { %v1522_v48 = vsel %vm1520_vm10, %v1517_v46, %v1519_v45 }
  0xb4   : > { %1912 = vmatmul.mubr.msk.f32.vlgmr.msra.gmra.mrb[0].mxu1 %vm226_vm3, %v1840_v39 }
  0xb5   : > { %1915 = vmatpush3.msk.msra.mxu1 %vm230_vm1, %v1191_v34  ;;  %1916 = vmatprep.mubr.msk.f32.mxu1 %vm1991_vm0, %v1990_v0 }
  0xb6   : > { %1843 = vmatmul.mubr.msk.f32.vlgmr.msra.gmra.mrb[0].mxu0 %vm226_vm3, %v1840_v39  ;;  %1919 = vmatprep.subr.mxu1 %v1990_v0 }
  0xb7   : > { %1848 = vmatpush1.msk.msra.mxu0 %vm230_vm1, %v1193_v41  ;;  %1268 = vmatprep.mubr.f32.mxu0 %v1990_v0 }
  0xb8   : > { %1853 = vmatprep.subr.msk.mxu0 %vm230_vm1, %v1358_v42 }
  0xbc   : > { %1917 = vmatmul.mubr.msk.f32.vlgmr.msra.gmra.mrb[0].mxu1 %vm226_vm3, %v1846_v44 }
  0xbd   : > { %1920 = vmatpush3.msk.msra.mxu1 %vm230_vm1, %v1355_v40  ;;  %1921 = vmatprep.mubr.msk.f32.mxu1 %vm1991_vm0, %v1990_v0 }
  0xbe   : > { %1849 = vmatmul.mubr.msk.f32.vlgmr.msra.gmra.mrb[0].mxu0 %vm226_vm3, %v1846_v44  ;;  %1924 = vmatprep.subr.mxu1 %v1990_v0 }
  0xbf   : > { %1854 = vmatpush1.msk.msra.mxu0 %vm230_vm1, %v1357_v47  ;;  %1432 = vmatprep.mubr.f32.mxu0 %v1990_v0 }
  0xc0   : > { %1859 = vmatprep.subr.msk.mxu0 %vm230_vm1, %v1522_v48 }
  0xc4   : > { %1922 = vmatmul.mubr.msk.f32.vlgmr.msra.gmra.mrb[0].mxu1 %vm226_vm3, %v1852_v50 }
  0xc5   : > { %1925 = vmatpush3.msk.msra.mxu1 %vm230_vm1, %v1519_v45  ;;  %1926 = vmatprep.mubr.msk.f32.mxu1 %vm1991_vm0, %v1990_v0 }
  0xc6   : > { %1855 = vmatmul.mubr.msk.f32.vlgmr.msra.gmra.mrb[0].mxu0 %vm226_vm3, %v1852_v50 }
  0xc7   : > { %1860 = vmatpush1.msk.msra.mxu0 %vm230_vm1, %v1521_v51  ;;  %1596 = vmatprep.mubr.f32.mxu0 %v1990_v0 }
  0xcc   : > { %1927 = vmatmul.mubr.msk.f32.vlgmr.msra.gmra.mrb[0].mxu1 %vm226_vm3, %v1858_v52 }
  0xce   : > { %1861 = vmatmul.mubr.msk.f32.vlgmr.msra.gmra.mrb[0].mxu0 %vm226_vm3, %v1858_v52 }
 0x19f   : > { %v1669_v61 = vpop.f32.mrb[0].mxu1 }
 0x1a0   : > { %1679 = vst.msk [vmem:[%s204_s28 + $0x10] sm:$0xff] %vm1678_vm11, %v1669_v61  ;;  %v1699_v63 = vmul.f32 %v1693_v59, %v1669_v61  ;;  %v1928_v0 = vpop.f32.mrb[1].mxu1 }
 0x1a1   : > { %v1598_v1 = vpop.f32.mrb[0].mxu0 }
 0x1a2   : > { %1676 = vst [vmem:[%s204_s28] sm:$0xff] %v1598_v1  ;;  %v1697_v2 = vmul.f32 %v1685_v60, %v1598_v1  ;;  %v1600_v3 = vpop.f32.mrb[1].mxu0  ;;  %v1707_v5 = vmul.f32 %v1699_v63, %v1669_v61  ;;  %v1701_v9 = vsel %vm1678_vm11, %v1699_v63, 0.0 }
 0x1a3   : > { %1677 = vst [vmem:[%s204_s28 + $0x8] sm:$0xff] %v1600_v3  ;;  %v1698_v4 = vmul.f32 %v1689_v62, %v1600_v3 }
 0x1a4   : > { %v1705_v6 = vmul.f32 %v1697_v2, %v1598_v1  ;;  %v1709_v12 = vsel %vm1678_vm11, %v1707_v5, 0.0 }
 0x1a5   : > { %v1706_v7 = vmul.f32 %v1698_v4, %v1600_v3  ;;  %v1700_v8 = vadd.f32 %v1698_v4, %v1697_v2 }
 0x1a7   : > { %v1702_v10 = vadd.f32 %v1701_v9, %v1700_v8  ;;  %v1708_v11 = vadd.f32 %v1706_v7, %v1705_v6 }
 0x1a9   : > { %1703 = vadd.xlane.f32.xlu0 %v1702_v10  ;;  %v1710_v13 = vadd.f32 %v1709_v12, %v1708_v11 }
 0x1ab   : > { %1711 = vadd.xlane.f32.xlu1 %v1710_v13 }
 0x236   : > { %v1704_v14 = vpop.xlane.xlu0 %1703 }
 0x238   : > { %v1712_v15 = vpop.xlane.xlu1 %1711 }
 0x239   : > { %v1714_v16 = vsel %vm1713_vm12, %v1704_v14, %v1712_v15 }
 0x23a   : > { %1716 = vst.msk [vmem:[%s208_s6] sm:$0xff] %vm1715_vm13, %v1714_v16 }
 0x23b PF: > { %s15_s15 = sadd.s32 1, %s1988_s15  }
 0x23c   : > { %p12_p4 = scmp.ge.s32.totalorder %s15_s15, 4  }
 0x23e   :  { %14 = sbr.rel (!%p12_p4) target bundleno = 1 (0x1), region = 82 }

</bundles_post_ra>
